<compile_context>
chip_gen: v7x
topology: tpu7x:2x2x1
jax: 0.10.0
libtpu: 0.0.40
codegen_flags: <defaults>
</compile_context>

<pallas_src>
import jax
import jax.numpy as jnp
from jax.experimental import pallas as pl
from jax.experimental.pallas import tpu as pltpu

LANE = 128
SUBLANE = 8
TILE_B_MAX = 256  # tiles >=256 rows keep the HBM pipeline near roofline at big batch


def _round_up(x, m):
    return ((x + m - 1) // m) * m


def qnet_kernel(s_ref, z_ref, w1s_ref, w1z_ref, b1_ref, w2_ref, b2_ref,
                w3_ref, b3_ref, out_ref):
    """Fused 3-layer MLP tile: 4 bf16 MXU matmuls (f32 acc) + f32 bias/ReLU."""
    s = s_ref[...].astype(jnp.bfloat16)            # (TB, s_dim)
    z = z_ref[...].astype(jnp.bfloat16)            # (TB, z_num)

    # Layer 1: split matmul replaces cat([s, z]) @ W1.
    h1 = jnp.dot(s, w1s_ref[...], preferred_element_type=jnp.float32)
    h1 = h1 + jnp.dot(z, w1z_ref[...], preferred_element_type=jnp.float32)
    h1 = jnp.maximum(h1 + b1_ref[...], 0.0)        # f32 elementwise (VPU)

    # Layer 2.
    h2 = jnp.dot(h1.astype(jnp.bfloat16), w2_ref[...],
                 preferred_element_type=jnp.float32)
    h2 = jnp.maximum(h2 + b2_ref[...], 0.0)

    # Layer 3 (lane-dense padded output -> unmasked stores).
    out = jnp.dot(h2.astype(jnp.bfloat16), w3_ref[...],
                  preferred_element_type=jnp.float32)
    out_ref[...] = (out + b3_ref[...]).astype(out_ref.dtype)


def prepare_params(params, s_dim):
    """One-time (out of the hot path) split / zero-pad / bf16-cast of the params.

    params are PyTorch-equivalent f32 arrays with W stored (in_features, out_features)
    so x @ W + b == PyTorch's x @ W.T + b.
    """
    w1, b1, w2, b2, w3, b3 = params
    in_dim, hidden = w1.shape
    a_num = w3.shape[1]
    hid_p = _round_up(hidden, LANE)
    a_p = _round_up(a_num, LANE)

    def pad2(a, rows, cols):
        return jnp.pad(a, ((0, rows - a.shape[0]), (0, cols - a.shape[1])))

    w1s = pad2(w1[:s_dim], s_dim, hid_p).astype(jnp.bfloat16)
    w1z = pad2(w1[s_dim:], in_dim - s_dim, hid_p).astype(jnp.bfloat16)
    w2p = pad2(w2, hid_p, hid_p).astype(jnp.bfloat16)
    w3p = pad2(w3, hid_p, a_p).astype(jnp.bfloat16)
    b1p = pad2(b1, 1, hid_p)                       # biases stay f32
    b2p = pad2(b2, 1, hid_p)
    b3p = pad2(b3, 1, a_p)
    return (w1s, w1z, b1p, w2p, b2p, w3p, b3p), a_num


def qnet_forward(s, z, prepared, a_num):
    """QNet forward: hot path in one Pallas kernel, batch-tiled."""
    w1s, w1z, b1, w2, b2, w3, b3 = prepared
    batch, s_dim = s.shape
    z_num = z.shape[1]
    a_p = w3.shape[1]

    tile_b = min(TILE_B_MAX, _round_up(batch, SUBLANE))
    b_pad = _round_up(batch, tile_b)
    if b_pad != batch:
        s = jnp.pad(s, ((0, b_pad - batch), (0, 0)))
        z = jnp.pad(z, ((0, b_pad - batch), (0, 0)))

    act_spec = lambda feat: pl.BlockSpec((tile_b, feat), lambda i: (i, 0))
    const_spec = lambda arr: pl.BlockSpec(arr.shape, lambda i: (0, 0))

    out_p = pl.pallas_call(
        qnet_kernel,
        out_shape=jax.ShapeDtypeStruct((b_pad, a_p), jnp.float32),
        grid=(b_pad // tile_b,),
        in_specs=[
            act_spec(s_dim),       # s
            act_spec(z_num),       # z
            const_spec(w1s),       # W1_s  (VMEM-resident across grid steps)
            const_spec(w1z),       # W1_z
            const_spec(b1),        # b1
            const_spec(w2),        # W2
            const_spec(b2),        # b2
            const_spec(w3),        # W3
            const_spec(b3),        # b3
        ],
        out_specs=act_spec(a_p),
        compiler_params=pltpu.CompilerParams(
            dimension_semantics=("parallel",)),
    )(s, z, w1s, w1z, b1, w2, b2, w3, b3)

    return out_p[:batch, :a_num]


def init_params(key, s_dim, z_num, hidden, a_num):
    """PyTorch nn.Linear-style init: U(-1/sqrt(fan_in), +1/sqrt(fan_in))."""
    in_dim = s_dim + z_num
    keys = jax.random.split(key, 6)

    def lin(kw, kb, fan_in, fan_out):
        bound = 1.0 / jnp.sqrt(fan_in)
        w = jax.random.uniform(kw, (fan_in, fan_out), jnp.float32, -bound, bound)
        b = jax.random.uniform(kb, (1, fan_out), jnp.float32, -bound, bound)
        return w, b

    w1, b1 = lin(keys[0], keys[1], in_dim, hidden)
    w2, b2 = lin(keys[2], keys[3], hidden, hidden)
    w3, b3 = lin(keys[4], keys[5], hidden, a_num)
    return (w1, b1, w2, b2, w3, b3)


def qnet_reference(s, z, params):
    """Pure-JAX reference with matching bf16-operand / f32-accumulate numerics."""
    w1, b1, w2, b2, w3, b3 = params
    bf = jnp.bfloat16
    x = jnp.concatenate([s, z], axis=-1)
    h1 = jnp.maximum(
        jnp.dot(x.astype(bf), w1.astype(bf),
                preferred_element_type=jnp.float32) + b1, 0.0)
    h2 = jnp.maximum(
        jnp.dot(h1.astype(bf), w2.astype(bf),
                preferred_element_type=jnp.float32) + b2, 0.0)
    return jnp.dot(h2.astype(bf), w3.astype(bf),
                   preferred_element_type=jnp.float32) + b3


if __name__ == "__main__":
    # Small shapes consistent with the module's forward.
    batch, s_dim, z_num, hidden, a_num = 8, 16, 8, 32, 6

    key = jax.random.PRNGKey(0)
    k_s, k_z, k_p = jax.random.split(key, 3)

    s = jax.random.normal(k_s, (batch, s_dim), jnp.float32)
    # z is typically a one-hot skill vector in DIAYN.
    z_idx = jax.random.randint(k_z, (batch,), 0, z_num)
    z = jax.nn.one_hot(z_idx, z_num, dtype=jnp.float32)

    params = init_params(k_p, s_dim, z_num, hidden, a_num)
    prepared, a_out = prepare_params(params, s_dim)

    out = qnet_forward(s, z, prepared, a_out)
    out = jax.block_until_ready(out)

    ref = qnet_reference(s, z, params)
    assert out.shape == (batch, a_num)
    assert jnp.allclose(out, ref, atol=1e-3, rtol=1e-3), (
        float(jnp.max(jnp.abs(out - ref))))

    print("KERNEL_OK")
</pallas_src>

<mosaic_0001>
module attributes {stable_mosaic.version = 11 : i64} {
  func.func @qnet_kernel(%arg0: i32, %arg1: memref<8x16xf32, #tpu.memory_space<vmem>>, %arg2: memref<8x8xf32, #tpu.memory_space<vmem>>, %arg3: memref<16x128xbf16, #tpu.memory_space<vmem>>, %arg4: memref<8x128xbf16, #tpu.memory_space<vmem>>, %arg5: memref<1x128xf32, #tpu.memory_space<vmem>>, %arg6: memref<128x128xbf16, #tpu.memory_space<vmem>>, %arg7: memref<1x128xf32, #tpu.memory_space<vmem>>, %arg8: memref<128x128xbf16, #tpu.memory_space<vmem>>, %arg9: memref<1x128xf32, #tpu.memory_space<vmem>>, %arg10: memref<8x128xf32, #tpu.memory_space<vmem>>) attributes {dimension_semantics = [#tpu.dimension_semantics<parallel>], iteration_bounds = array<i64: 1>, scalar_prefetch = 0 : i64, scratch_operands = 0 : i64, tpu.core_type = #tpu.core_type<tc>, window_params = [{transform_indices = @transform_0, window_bounds = array<i64: 8, 16>}, {transform_indices = @transform_1, window_bounds = array<i64: 8, 8>}, {pipeline_mode = #tpu.pipeline_mode<synchronous>, transform_indices = @transform_2, window_bounds = array<i64: 16, 128>}, {pipeline_mode = #tpu.pipeline_mode<synchronous>, transform_indices = @transform_3, window_bounds = array<i64: 8, 128>}, {pipeline_mode = #tpu.pipeline_mode<synchronous>, transform_indices = @transform_4, window_bounds = array<i64: 1, 128>}, {pipeline_mode = #tpu.pipeline_mode<synchronous>, transform_indices = @transform_5, window_bounds = array<i64: 128, 128>}, {pipeline_mode = #tpu.pipeline_mode<synchronous>, transform_indices = @transform_6, window_bounds = array<i64: 1, 128>}, {pipeline_mode = #tpu.pipeline_mode<synchronous>, transform_indices = @transform_7, window_bounds = array<i64: 128, 128>}, {pipeline_mode = #tpu.pipeline_mode<synchronous>, transform_indices = @transform_8, window_bounds = array<i64: 1, 128>}, {transform_indices = @transform_9, window_bounds = array<i64: 8, 128>}]} {
    %c0 = arith.constant 0 : index
    %c0_0 = arith.constant 0 : index
    %0 = vector.load %arg1[%c0, %c0_0] : memref<8x16xf32, #tpu.memory_space<vmem>>, vector<8x16xf32>
    %1 = arith.truncf %0 : vector<8x16xf32> to vector<8x16xbf16>
    %c0_1 = arith.constant 0 : index
    %c0_2 = arith.constant 0 : index
    %2 = vector.load %arg2[%c0_1, %c0_2] : memref<8x8xf32, #tpu.memory_space<vmem>>, vector<8x8xf32>
    %3 = arith.truncf %2 : vector<8x8xf32> to vector<8x8xbf16>
    %c0_3 = arith.constant 0 : index
    %c0_4 = arith.constant 0 : index
    %4 = vector.load %arg3[%c0_3, %c0_4] : memref<16x128xbf16, #tpu.memory_space<vmem>>, vector<16x128xbf16>
    %cst = arith.constant dense<0.000000e+00> : vector<8x128xf32>
    %5 = tpu.matmul %1, %4, %cst {dimension_numbers = #tpu.dot_dimension_numbers<[1], [0], [0], [1], [0, 0, 1, 1], [], []>} : vector<8x16xbf16>, vector<16x128xbf16>, vector<8x128xf32> -> vector<8x128xf32>
    %c0_5 = arith.constant 0 : index
    %c0_6 = arith.constant 0 : index
    %6 = vector.load %arg4[%c0_5, %c0_6] : memref<8x128xbf16, #tpu.memory_space<vmem>>, vector<8x128xbf16>
    %cst_7 = arith.constant dense<0.000000e+00> : vector<8x128xf32>
    %7 = tpu.matmul %3, %6, %cst_7 {dimension_numbers = #tpu.dot_dimension_numbers<[1], [0], [0], [1], [0, 0, 1, 1], [], []>} : vector<8x8xbf16>, vector<8x128xbf16>, vector<8x128xf32> -> vector<8x128xf32>
    %8 = arith.addf %5, %7 : vector<8x128xf32>
    %c0_8 = arith.constant 0 : index
    %c0_9 = arith.constant 0 : index
    %9 = vector.load %arg5[%c0_8, %c0_9] : memref<1x128xf32, #tpu.memory_space<vmem>>, vector<1x128xf32>
    %10 = vector.broadcast %9 : vector<1x128xf32> to vector<8x128xf32>
    %11 = arith.addf %8, %10 : vector<8x128xf32>
    %cst_10 = arith.constant 0.000000e+00 : f32
    %12 = vector.broadcast %cst_10 : f32 to vector<8x128xf32>
    %13 = arith.maximumf %11, %12 : vector<8x128xf32>
    %14 = arith.truncf %13 : vector<8x128xf32> to vector<8x128xbf16>
    %c0_11 = arith.constant 0 : index
    %c0_12 = arith.constant 0 : index
    %15 = vector.load %arg6[%c0_11, %c0_12] : memref<128x128xbf16, #tpu.memory_space<vmem>>, vector<128x128xbf16>
    %cst_13 = arith.constant dense<0.000000e+00> : vector<8x128xf32>
    %16 = tpu.matmul %14, %15, %cst_13 {dimension_numbers = #tpu.dot_dimension_numbers<[1], [0], [0], [1], [0, 0, 1, 1], [], []>} : vector<8x128xbf16>, vector<128x128xbf16>, vector<8x128xf32> -> vector<8x128xf32>
    %c0_14 = arith.constant 0 : index
    %c0_15 = arith.constant 0 : index
    %17 = vector.load %arg7[%c0_14, %c0_15] : memref<1x128xf32, #tpu.memory_space<vmem>>, vector<1x128xf32>
    %18 = vector.broadcast %17 : vector<1x128xf32> to vector<8x128xf32>
    %19 = arith.addf %16, %18 : vector<8x128xf32>
    %cst_16 = arith.constant 0.000000e+00 : f32
    %20 = vector.broadcast %cst_16 : f32 to vector<8x128xf32>
    %21 = arith.maximumf %19, %20 : vector<8x128xf32>
    %22 = arith.truncf %21 : vector<8x128xf32> to vector<8x128xbf16>
    %c0_17 = arith.constant 0 : index
    %c0_18 = arith.constant 0 : index
    %23 = vector.load %arg8[%c0_17, %c0_18] : memref<128x128xbf16, #tpu.memory_space<vmem>>, vector<128x128xbf16>
    %cst_19 = arith.constant dense<0.000000e+00> : vector<8x128xf32>
    %24 = tpu.matmul %22, %23, %cst_19 {dimension_numbers = #tpu.dot_dimension_numbers<[1], [0], [0], [1], [0, 0, 1, 1], [], []>} : vector<8x128xbf16>, vector<128x128xbf16>, vector<8x128xf32> -> vector<8x128xf32>
    %c0_20 = arith.constant 0 : index
    %c0_21 = arith.constant 0 : index
    %25 = vector.load %arg9[%c0_20, %c0_21] : memref<1x128xf32, #tpu.memory_space<vmem>>, vector<1x128xf32>
    %26 = vector.broadcast %25 : vector<1x128xf32> to vector<8x128xf32>
    %27 = arith.addf %24, %26 : vector<8x128xf32>
    %c0_22 = arith.constant 0 : index
    %c0_23 = arith.constant 0 : index
    %28 = vector.load %arg10[%c0_22, %c0_23] : memref<8x128xf32, #tpu.memory_space<vmem>>, vector<8x128xf32>
    tpu.vector_store %arg10[%c0_22, %c0_23], %27 {strides = array<i32>} : memref<8x128xf32, #tpu.memory_space<vmem>>, vector<8x128xf32>,
    return
  }
  func.func @transform_0(%arg0: i32) -> (i32, i32) {
    %c0_i32 = arith.constant 0 : i32
    %c0_i32_0 = arith.constant 0 : i32
    return %arg0, %c0_i32 : i32, i32
  }
  func.func @transform_1(%arg0: i32) -> (i32, i32) {
    %c0_i32 = arith.constant 0 : i32
    %c0_i32_0 = arith.constant 0 : i32
    return %arg0, %c0_i32 : i32, i32
  }
  func.func @transform_2(%arg0: i32) -> (i32, i32) {
    %c0_i32 = arith.constant 0 : i32
    %c0_i32_0 = arith.constant 0 : i32
    %c0_i32_1 = arith.constant 0 : i32
    return %c0_i32, %c0_i32_0 : i32, i32
  }
  func.func @transform_3(%arg0: i32) -> (i32, i32) {
    %c0_i32 = arith.constant 0 : i32
    %c0_i32_0 = arith.constant 0 : i32
    %c0_i32_1 = arith.constant 0 : i32
    return %c0_i32, %c0_i32_0 : i32, i32
  }
  func.func @transform_4(%arg0: i32) -> (i32, i32) {
    %c0_i32 = arith.constant 0 : i32
    %c0_i32_0 = arith.constant 0 : i32
    %c0_i32_1 = arith.constant 0 : i32
    return %c0_i32, %c0_i32_0 : i32, i32
  }
  func.func @transform_5(%arg0: i32) -> (i32, i32) {
    %c0_i32 = arith.constant 0 : i32
    %c0_i32_0 = arith.constant 0 : i32
    %c0_i32_1 = arith.constant 0 : i32
    return %c0_i32, %c0_i32_0 : i32, i32
  }
  func.func @transform_6(%arg0: i32) -> (i32, i32) {
    %c0_i32 = arith.constant 0 : i32
    %c0_i32_0 = arith.constant 0 : i32
    %c0_i32_1 = arith.constant 0 : i32
    return %c0_i32, %c0_i32_0 : i32, i32
  }
  func.func @transform_7(%arg0: i32) -> (i32, i32) {
    %c0_i32 = arith.constant 0 : i32
    %c0_i32_0 = arith.constant 0 : i32
    %c0_i32_1 = arith.constant 0 : i32
    return %c0_i32, %c0_i32_0 : i32, i32
  }
  func.func @transform_8(%arg0: i32) -> (i32, i32) {
    %c0_i32 = arith.constant 0 : i32
    %c0_i32_0 = arith.constant 0 : i32
    %c0_i32_1 = arith.constant 0 : i32
    return %c0_i32, %c0_i32_0 : i32, i32
  }
  func.func @transform_9(%arg0: i32) -> (i32, i32) {
    %c0_i32 = arith.constant 0 : i32
    %c0_i32_0 = arith.constant 0 : i32
    return %arg0, %c0_i32 : i32, i32
  }
}

</mosaic_0001>

<bundles_post_ra>
// kernel: tpu_custom_call.1
= control target key start
LH: loop header
LB: loop body
LE: loop exit
PB: predicated region body
PF: predicated region fallthrough
CT: control target
= control target key end

     0   :  { %14 = vsyncpa [#allocation3], 0  ;;  %s897_s0 = inlined_call_operand.hbm [shape: f32[8,16], index: 0, kind: input, shape index: {}]   ;;  %s898_s1 = inlined_call_operand.hbm [shape: f32[8,8], index: 1, kind: input, shape index: {}]   ;;  %s899_s2 = inlined_call_operand.hbm [shape: bf16[16,128], index: 2, kind: input, shape index: {}]   ;;  %s900_s3 = inlined_call_operand.vmem [shape: bf16[8,128], index: 3, kind: input, shape index: {}]   ;;  %s901_s4 = inlined_call_operand.vmem [shape: f32[1,128], index: 4, kind: input, shape index: {}]   ;;  %s902_s5 = inlined_call_operand.hbm [shape: bf16[128,128], index: 5, kind: input, shape index: {}]   ;;  %s903_s6 = inlined_call_operand.vmem [shape: f32[1,128], index: 6, kind: input, shape index: {}]   ;;  %s904_s7 = inlined_call_operand.hbm [shape: bf16[128,128], index: 7, kind: input, shape index: {}]   ;;  %s905_s8 = inlined_call_operand.vmem [shape: f32[1,128], index: 8, kind: input, shape index: {}]   ;;  %s906_s9 = inlined_call_operand.hbm [shape: f32[8,128], index: 9, kind: output, shape index: {}]  }
   0x1   :  { %15 = vsyncpa [#allocation6], 0 }
   0x2   :  { %16 = vsyncpa [#allocation9], 0 }
   0x3   :  { %17 = vsyncpa [#allocation4], 0  ;;  %s718_s30 = smov [#allocation5]   ;;  %s578_s13 = scalar_lea.hbm %s898_s1, 128 }
   0x4   :  { %s34_s10 = sshll.u32 %s718_s30, 4  ;;  %p579_p0 = scmp.ne.s32.totalorder %s898_s1, %s578_s13  ;;  %s35_s10 = int_to_ptr.vmem [resolvable:$true] %s34_s10 }
   0x5   :  { %p582_p1 = scmp.lt.u32.totalorder %s578_s13, %s898_s1 }
   0x7   :  { %p584_p2 = pnand %p582_p1, %p579_p0 }
   0x9   :  { %587 = shalt.err (!%p584_p2)
}
   0xa   :  { %s588_s18 = scalar_lea.vmem %s35_s10, 128  ;;  %p593_p4 = scmp.lt.s32.totalorder %s35_s10, %s35_s10 }
   0xb   :  { %p589_p3 = scmp.ne.s32.totalorder %s35_s10, %s588_s18  ;;  %p594_p5 = scmp.lt.s32.totalorder %s588_s18, %s588_s18 }
   0xd   :  { %p595_p6 = por %p594_p5, %p593_p4 }
   0xf   :  { %p596_p7 = pnand %p595_p6, %p589_p3 }
  0x11   :  { %599 = shalt.err (!%p596_p7)
}
  0x12   :  { %37 = dma.hbm_to_vmem [thread:$0]  %s898_s1, 128, %s35_s10, [#allocation6]  }
  0x13   :  { %s719_s21 = smov [#allocation8]   ;;  %s720_s23 = smov [#allocation2]  }
  0x14   :  { %s59_s22 = sshll.u32 %s719_s21, 4  ;;  %s24_s24 = sshll.u32 %s720_s23, 4  ;;  %s60_s22 = int_to_ptr.vmem [resolvable:$true] %s59_s22  ;;  %s25_s24 = int_to_ptr.vmem [resolvable:$true] %s24_s24 }
  0x15   :  { %s600_s27 = scalar_lea.hbm %s902_s5, 1024 }
  0x16   :  { %p601_p8 = scmp.ne.s32.totalorder %s902_s5, %s600_s27  ;;  %p604_p9 = scmp.lt.u32.totalorder %s600_s27, %s902_s5 }
  0x18   :  { %p606_p10 = pnand %p604_p9, %p601_p8 }
  0x1a   :  { %609 = shalt.err (!%p606_p10)
}
  0x1b   :  { %s610_s1 = scalar_lea.vmem %s60_s22, 1024  ;;  %p615_p12 = scmp.lt.s32.totalorder %s60_s22, %s60_s22 }
  0x1c   :  { %p611_p11 = scmp.ne.s32.totalorder %s60_s22, %s610_s1  ;;  %p616_p13 = scmp.lt.s32.totalorder %s610_s1, %s610_s1 }
  0x1e   :  { %p617_p0 = por %p616_p13, %p615_p12 }
  0x20   :  { %p618_p1 = pnand %p617_p0, %p611_p11 }
  0x22   :  { %621 = shalt.err (!%p618_p1)
}
  0x23   :  { %s721_s10 = smov 64   ;;  %s722_s12 = smov 4  }
  0x24   :  { %65 = dma.hbm_to_vmem [thread:$0]  %s902_s5, 1024, %s60_s22, [#allocation9], %s721_s10, %s721_s10, %s722_s12  }
  0x25   :  { %s622_s17 = scalar_lea.hbm %s897_s0, 128 }
  0x26   :  { %p623_p2 = scmp.ne.s32.totalorder %s897_s0, %s622_s17  ;;  %p626_p3 = scmp.lt.u32.totalorder %s622_s17, %s897_s0 }
  0x28   :  { %p628_p4 = pnand %p626_p3, %p623_p2 }
  0x2a   :  { %631 = shalt.err (!%p628_p4)
}
  0x2b   :  { %s632_s23 = scalar_lea.vmem %s25_s24, 128  ;;  %p637_p6 = scmp.lt.s32.totalorder %s25_s24, %s25_s24 }
  0x2c   :  { %p633_p5 = scmp.ne.s32.totalorder %s25_s24, %s632_s23  ;;  %p638_p7 = scmp.lt.s32.totalorder %s632_s23, %s632_s23 }
  0x2e   :  { %p639_p8 = por %p638_p7, %p637_p6 }
  0x30   :  { %p640_p9 = pnand %p639_p8, %p633_p5 }
  0x32   :  { %643 = shalt.err (!%p640_p9)
}
  0x33   :  { %27 = dma.hbm_to_vmem [thread:$0]  %s897_s0, 128, %s25_s24, [#allocation3]  }
  0x34   :  { %s723_s25 = smov [#allocation7]   ;;  %s724_s27 = smov [#allocation10]  }
  0x35   :  { %s43_s26 = sshll.u32 %s723_s25, 4  ;;  %s73_s28 = sshll.u32 %s724_s27, 4  ;;  %s44_s26 = int_to_ptr.vmem [resolvable:$true] %s43_s26  ;;  %s74_s28 = int_to_ptr.vmem [resolvable:$true] %s73_s28 }
  0x36   :  { %s644_s11 = scalar_lea.hbm %s899_s2, 128 }
  0x37   :  { %p645_p10 = scmp.ne.s32.totalorder %s899_s2, %s644_s11  ;;  %p648_p11 = scmp.lt.u32.totalorder %s644_s11, %s899_s2 }
  0x39   :  { %p650_p12 = pnand %p648_p11, %p645_p10 }
  0x3b   :  { %653 = shalt.err (!%p650_p12)
}
  0x3c   :  { %s654_s0 = scalar_lea.vmem %s44_s26, 128  ;;  %p659_p0 = scmp.lt.s32.totalorder %s44_s26, %s44_s26 }
  0x3d   :  { %p655_p13 = scmp.ne.s32.totalorder %s44_s26, %s654_s0  ;;  %p660_p1 = scmp.lt.s32.totalorder %s654_s0, %s654_s0 }
  0x3f   :  { %p661_p2 = por %p660_p1, %p659_p0 }
  0x41   :  { %p662_p3 = pnand %p661_p2, %p655_p13 }
  0x43   :  { %665 = shalt.err (!%p662_p3)
}
  0x44   :  { %49 = dma.hbm_to_vmem [thread:$0]  %s899_s2, 128, %s44_s26, [#allocation6], %s721_s10, %s721_s10, %s722_s12  }
  0x45   :  { %s666_s19 = scalar_lea.hbm %s904_s7, 1024 }
  0x46   :  { %p667_p4 = scmp.ne.s32.totalorder %s904_s7, %s666_s19  ;;  %p670_p5 = scmp.lt.u32.totalorder %s666_s19, %s904_s7 }
  0x48   :  { %p672_p6 = pnand %p670_p5, %p667_p4 }
  0x4a   :  { %675 = shalt.err (!%p672_p6)
}
  0x4b   :  { %s676_s22 = scalar_lea.vmem %s74_s28, 1024  ;;  %p681_p8 = scmp.lt.s32.totalorder %s74_s28, %s74_s28 }
  0x4c   :  { %p677_p7 = scmp.ne.s32.totalorder %s74_s28, %s676_s22  ;;  %p682_p9 = scmp.lt.s32.totalorder %s676_s22, %s676_s22 }
  0x4e   :  { %p683_p10 = por %p682_p9, %p681_p8 }
  0x50   :  { %p684_p11 = pnand %p683_p10, %p677_p7 }
  0x52   :  { %687 = shalt.err (!%p684_p11)
}
  0x53   :  { %79 = dma.hbm_to_vmem [thread:$0]  %s904_s7, 1024, %s74_s28, [#allocation9], %s721_s10, %s721_s10, %s722_s12  }
  0x54   :  { %710 = dma.done.wait [#allocation3], 128  }
  0x55   :  { %711 = vsyncadd [#allocation3], 4294967168 }
  0x56   :  { %712 = dma.done.wait [#allocation6], 256  }
  0x57   :  { %713 = vsyncadd [#allocation6], 4294967040 }
  0x58   :  { %714 = dma.done.wait [#allocation9], 2048  }
  0x59   :  { %715 = vsyncadd [#allocation9], 4294965248  ;;  %v725_v0 = vmov 0.0   ;;  %vm726_vm0 = vmmov 0   ;;  %vm109_vm1 = vcmask 1043456   ;;  %v561_v3 = vld [vmem:[#allocation7] sm:$0xff]  }
  0x5a   :  { %499 = vmatprep.subr.bf16.mxu0 %v725_v0  ;;  %505 = vmatprep.subr.bf16.mxu1 %v725_v0  ;;  %v104_v1 = vld [vmem:[%s900_s3] sm:$0xf]  ;;  %v100_v4 = vld [vmem:[#allocation5] sm:$0xff]  ;;  %vm105_vm2 = vcmask 64512   ;;  %v562_v8 = vld [vmem:[#allocation8] sm:$0xff]   ;;  %vm159_vm3 = vcmask 130048  }
  0x5b   :  { %501 = vmatprep.mubr.msk.bf16.mxu0 %vm726_vm0, %v725_v0  ;;  %507 = vmatprep.mubr.msk.bf16.mxu1 %vm726_vm0, %v725_v0  ;;  %v111_v2 = vsel %vm109_vm1, %v104_v1, 0  ;;  %v98_v5 = vld [vmem:[#allocation2] sm:$0xff]  ;;  %v101_v6 = vpack.c.bf16 %v100_v4, %v100_v4  ;;  %v564_v10 = vld [vmem:[#allocation8 + $0x10] sm:$0xff]   ;;  %v565_v11 = vld [vmem:[#allocation8 + $0x18] sm:$0xff]   ;;  %s727_s29 = smov [#allocation11]  }
  0x5c   :  { %500 = vmatpush3.bf16.msra.mxu0 %v111_v2  ;;  %v99_v7 = vpack.c.bf16 %v98_v5, %v98_v5  ;;  %506 = vmatpush3.bf16.msra.mxu1 %v561_v3  ;;  %v563_v9 = vld [vmem:[#allocation8 + $0x8] sm:$0xff]   ;;  %v566_v12 = vld [vmem:[#allocation8 + $0x20] sm:$0xff]   ;;  %v568_v14 = vld [vmem:[#allocation8 + $0x30] sm:$0xff]   ;;  %s444_s30 = sshll.u32 %s727_s29, 4  ;;  %s445_s30 = int_to_ptr.vmem [resolvable:$true] %s444_s30 }
  0x5d   :  { %511 = vmatprep.subr.bf16.mxu0 %v725_v0  ;;  %531 = vmatprep.subr.bf16.mxu1 %v725_v0  ;;  %v567_v13 = vld [vmem:[#allocation8 + $0x28] sm:$0xff]   ;;  %v569_v15 = vld [vmem:[#allocation8 + $0x38] sm:$0xff]   ;;  %v570_v16 = vld [vmem:[#allocation10] sm:$0xff]   ;;  %p693_p13 = scmp.lt.s32.totalorder %s445_s30, %s445_s30 }
  0x5e   :  { %v571_v17 = vld [vmem:[#allocation10 + $0x8] sm:$0xff]   ;;  %v572_v18 = vld [vmem:[#allocation10 + $0x10] sm:$0xff]   ;;  %v573_v19 = vld [vmem:[#allocation10 + $0x18] sm:$0xff]  }
  0x5f   :  { %502 = vmatmul.mubr.msk.bf16.vlgmr.msra.gmra.mrb[0].mxu0 %vm105_vm2, %v101_v6  ;;  %508 = vmatmul.mubr.msk.bf16.vlgmr.msra.gmra.mrb[0].mxu1 %vm159_vm3, %v99_v7  ;;  %v574_v20 = vld [vmem:[#allocation10 + $0x20] sm:$0xff]   ;;  %v575_v21 = vld [vmem:[#allocation10 + $0x28] sm:$0xff]   ;;  %v576_v35 = vld [vmem:[#allocation10 + $0x30] sm:$0xff]  }
  0x60   :  { %512 = vmatpush3.bf16.msra.mxu0 %v562_v8  ;;  %527 = vmatprep.mubr.msk.bf16.mxu0 %vm726_vm0, %v725_v0  ;;  %v458_v25 = vld [vmem:[%s901_s4] ss:$0 sm:$0xff]  ;;  %v577_v36 = vld [vmem:[#allocation10 + $0x38] sm:$0xff]  }
  0x61   :  { %513 = vmatprep.subr.bf16.mxu0 %v725_v0  ;;  %547 = vmatprep.mubr.msk.bf16.mxu1 %vm726_vm0, %v725_v0  ;;  %v459_v37 = vld [vmem:[%s903_s6] ss:$0 sm:$0xff]  ;;  %s688_s6 = scalar_lea.vmem %s445_s30, 128 }
  0x62   :  { %532 = vmatpush3.bf16.msra.mxu1 %v570_v16  ;;  %v468_v45 = vld [vmem:[%s905_s8] ss:$0 sm:$0xff]  ;;  %p689_p12 = scmp.ne.s32.totalorder %s445_s30, %s688_s6  ;;  %p694_p0 = scmp.lt.s32.totalorder %s688_s6, %s688_s6 }
  0x63   :  { %533 = vmatprep.subr.bf16.mxu1 %v725_v0 }
  0x64   :  { %514 = vmatpush3.bf16.msra.mxu0 %v563_v9  ;;  %p695_p1 = por %p694_p0, %p693_p13 }
  0x65   :  { %515 = vmatprep.subr.bf16.mxu0 %v725_v0 }
  0x66   :  { %534 = vmatpush3.bf16.msra.mxu1 %v571_v17  ;;  %p696_p2 = pnand %p695_p1, %p689_p12 }
  0x67   :  { %535 = vmatprep.subr.bf16.mxu1 %v725_v0 }
  0x68   :  { %516 = vmatpush3.bf16.msra.mxu0 %v564_v10 }
  0x69   :  { %517 = vmatprep.subr.bf16.mxu0 %v725_v0 }
  0x6a   :  { %536 = vmatpush3.bf16.msra.mxu1 %v572_v18 }
  0x6b   :  { %537 = vmatprep.subr.bf16.mxu1 %v725_v0 }
  0x6c   :  { %518 = vmatpush3.bf16.msra.mxu0 %v565_v11 }
  0x6d   :  { %519 = vmatprep.subr.bf16.mxu0 %v725_v0 }
  0x6e   :  { %538 = vmatpush3.bf16.msra.mxu1 %v573_v19 }
  0x6f   :  { %539 = vmatprep.subr.bf16.mxu1 %v725_v0 }
  0x70   :  { %520 = vmatpush3.bf16.msra.mxu0 %v566_v12 }
  0x71   :  { %521 = vmatprep.subr.bf16.mxu0 %v725_v0 }
  0x72   :  { %540 = vmatpush3.bf16.msra.mxu1 %v574_v20 }
  0x73   :  { %541 = vmatprep.subr.bf16.mxu1 %v725_v0 }
  0x74   :  { %522 = vmatpush3.bf16.msra.mxu0 %v567_v13 }
  0x75   :  { %523 = vmatprep.subr.bf16.mxu0 %v725_v0 }
  0x76   :  { %542 = vmatpush3.bf16.msra.mxu1 %v575_v21 }
  0x77   :  { %543 = vmatprep.subr.bf16.mxu1 %v725_v0 }
  0x78   :  { %524 = vmatpush3.bf16.msra.mxu0 %v568_v14 }
  0x79   :  { %525 = vmatprep.subr.bf16.mxu0 %v725_v0 }
  0x7a   :  { %544 = vmatpush3.bf16.msra.mxu1 %v576_v35 }
  0x7b   :  { %545 = vmatprep.subr.bf16.mxu1 %v725_v0 }
  0x7c   :  { %526 = vmatpush3.bf16.msra.mxu0 %v569_v15 }
  0x7e   :  { %546 = vmatpush3.bf16.msra.mxu1 %v577_v36 }
 0x132   :  { %v147_v22 = vpop.f32.mrb[0].mxu0  ;;  %v197_v24 = vpop.f32.mrb[0].mxu1 }
 0x133   :  { %v503_v23 = vpop.f32.mrb[1].mxu0  ;;  %v198_v26 = vadd.f32 %v197_v24, %v147_v22  ;;  %v509_v28 = vpop.f32.mrb[1].mxu1 }
 0x134   :  { %v150_v27 = vpop.f32.mrb[2].mxu0  ;;  %v200_v30 = vpop.f32.mrb[2].mxu1 }
 0x135   :  { %v504_v29 = vpop.f32.mrb[3].mxu0  ;;  %v210_v31 = vadd.f32 %v458_v25, %v198_v26  ;;  %v510_v32 = vpop.f32.mrb[3].mxu1 }
 0x137   :  { %v211_v33 = vmax.f32 %v210_v31, 0.0 }
 0x139   :  { %v212_v34 = vpack.c.bf16 %v211_v33, %v211_v33 }
 0x13b   :  { %528 = vmatmul.mubr.bf16.vlgmr.msra.gmra.mrb[4].mxu0 %v212_v34 }
 0x20e   :  { %v318_v38 = vpop.f32.mrb[4].mxu0 }
 0x20f   :  { %v319_v39 = vadd.f32 %v459_v37, %v318_v38  ;;  %v529_v40 = vpop.f32.mrb[5].mxu0 }
 0x210   :  { %v321_v41 = vpop.f32.mrb[6].mxu0 }
 0x211   :  { %v324_v42 = vmax.f32 %v319_v39, 0.0  ;;  %v530_v43 = vpop.f32.mrb[7].mxu0 }
 0x213   :  { %v325_v44 = vpack.c.bf16 %v324_v42, %v324_v42 }
 0x215   :  { %548 = vmatmul.mubr.bf16.vlgmr.msra.gmra.mrb[4].mxu1 %v325_v44 }
 0x2e8   :  { %v431_v46 = vpop.f32.mrb[4].mxu1 }
 0x2e9   :  { %v432_v47 = vadd.f32 %v468_v45, %v431_v46  ;;  %v549_v48 = vpop.f32.mrb[5].mxu1 }
 0x2ea   :  { %v434_v49 = vpop.f32.mrb[6].mxu1 }
 0x2eb   :  { %437 = vst [vmem:[#allocation11] sm:$0xff] %v432_v47  ;;  %v550_v50 = vpop.f32.mrb[7].mxu1 }
 0x2ec   :  { %699 = shalt.err (!%p696_p2)
}
 0x2ed   :  { %s700_s8 = scalar_lea.hbm %s906_s9, 128 }
 0x2ee   :  { %p701_p3 = scmp.ne.s32.totalorder %s906_s9, %s700_s8  ;;  %p704_p4 = scmp.lt.u32.totalorder %s700_s8, %s906_s9 }
 0x2f0   :  { %p706_p5 = pnand %p704_p4, %p701_p3 }
 0x2f2   :  { %709 = shalt.err (!%p706_p5)
}
 0x2f3   :  { %447 = dma.vmem_to_hbm [thread:$0]  %s445_s30, 128, %s906_s9, [#allocation4]  }
 0x2f4   :  { %716 = dma.done.wait [#allocation4], 128  }
 0x2f5   :  { %717 = vsyncadd [#allocation4], 4294967168 }
 0x2f6   :  { %451 = vsyncpa [#allocation3], 1 }
 0x2f7   :  { %452 = vsyncpa [#allocation6], 1 }
 0x2f8   :  { %453 = vsyncpa [#allocation9], 1 }
 0x2f9   :  { %454 = vsyncpa [#allocation4], 1 }

</bundles_post_ra>
